<compile_context>
chip_gen: v6e
topology: v6e:2x2x1
jax: 0.10.0
libtpu: 0.0.40
codegen_flags: <defaults>
</compile_context>

<pallas_src>
import functools

import jax
import jax.numpy as jnp
from jax.experimental import pallas as pl
from jax.experimental.pallas import tpu as pltpu

NEG_SLOPE = 0.2


def _round_up(x, m):
    return ((x + m - 1) // m) * m


def hetgcn_aggregate_kernel(src_ref, expand_ref, adj_ref, out_ref, acc_ref, *, hd):
    """One (dst-tile, src-tile) step of the factored attention aggregation.

    src_ref   : (Ts, HD+H)  matmul_dtype  packed per-source RHS [weighted | w]
    expand_ref: (H, HD)     f32           expand[h, h*D+d] = 1 (head -> lane broadcast)
    adj_ref   : (Td, Ts)    matmul_dtype  0/1 adjacency tile (dst x src)
    out_ref   : (Td, HD)    f32           output tile
    acc_ref   : (Td, HD+H)  f32           accumulator, resident across the src axis
    """
    k = pl.program_id(1)

    @pl.when(k == 0)
    def _init():
        acc_ref[...] = jnp.zeros_like(acc_ref)

    # Fused unnorm/denom matmul: adj @ [weighted | w] -> single MXU pass per step.
    acc_ref[...] += jnp.dot(adj_ref[...], src_ref[...],
                            preferred_element_type=jnp.float32)

    @pl.when(k == pl.num_programs(1) - 1)
    def _finalize():
        agg = acc_ref[...]
        unnorm = agg[:, :hd]                               # (Td, HD)
        denom = agg[:, hd:]                                # (Td, H)  -- tiny
        # Exact reciprocal on only Td*H elements; zero in-degree rows -> 0 output.
        inv = jnp.where(denom > 0, 1.0 / denom, 0.0)       # (Td, H)
        inv_b = jnp.dot(inv, expand_ref[...],
                        preferred_element_type=jnp.float32)  # (Td, HD) broadcast per head
        out_ref[...] = (unnorm * inv_b).astype(out_ref.dtype)


def hetgcn_attention(feat_src, adj, attn_l, *, num_heads, in_size,
                     dst_tile=256, src_tile=1024, matmul_dtype=jnp.bfloat16,
                     negative_slope=NEG_SLOPE):
    """feat_src: (N_src, H*D) f32, adj: (N_dst, N_src) 0/1, attn_l: (H, D) f32."""
    H, D = num_heads, in_size
    HD = H * D
    n_src, n_dst = feat_src.shape[0], adj.shape[0]

    # ---- Per-source preparation, hoisted out of the grid (computed exactly once) ----
    h3 = feat_src.astype(jnp.float32).reshape(n_src, H, D)
    el = jnp.einsum('nhd,hd->nh', h3, attn_l.astype(jnp.float32))        # (Ns, H)
    e = jnp.where(el >= 0, el, negative_slope * el)                      # leaky_relu
    # Softmax is invariant to a per-head shift; use the global per-head max over the
    # REAL source rows only (padding is added after this, so it never affects the max).
    e = e - jnp.max(e, axis=0, keepdims=True)
    w = jnp.exp(e)                                                       # (Ns, H)
    weighted = (w[:, :, None] * h3).reshape(n_src, HD)                   # (Ns, HD)
    src_rhs = jnp.concatenate([weighted, w], axis=1)                     # (Ns, HD+H)

    # ---- Tiling / padding (zero padding is exact: padded adj & src rows are 0) ----
    src_tile = max(128, _round_up(src_tile, 128))
    src_tile = min(src_tile, _round_up(n_src, 128))
    n_src_p = _round_up(n_src, src_tile)
    dst_tile = max(8, _round_up(dst_tile, 8))
    dst_tile = min(dst_tile, _round_up(n_dst, 8))
    n_dst_p = _round_up(n_dst, dst_tile)

    # Pre-cast to the matmul dtype in the wrapper (adj 0/1 is exact in bf16).
    src_rhs_p = jnp.pad(src_rhs, ((0, n_src_p - n_src), (0, 0))).astype(matmul_dtype)
    adj_p = jnp.pad(adj.astype(jnp.float32),
                    ((0, n_dst_p - n_dst), (0, n_src_p - n_src))).astype(matmul_dtype)

    # Head-expansion matrix: expand[h, h*D+d] = 1.
    cols = jnp.arange(HD)
    expand = (cols[None, :] // D == jnp.arange(H)[:, None]).astype(jnp.float32)

    grid = (n_dst_p // dst_tile, n_src_p // src_tile)
    kernel = functools.partial(hetgcn_aggregate_kernel, hd=HD)

    out = pl.pallas_call(
        kernel,
        out_shape=jax.ShapeDtypeStruct((n_dst_p, HD), jnp.float32),
        grid_spec=pltpu.PrefetchScalarGridSpec(
            num_scalar_prefetch=0,
            grid=grid,
            in_specs=[
                pl.BlockSpec((src_tile, HD + H), lambda i, k: (k, 0)),    # [weighted|w]
                pl.BlockSpec((H, HD), lambda i, k: (0, 0)),               # expand (resident)
                pl.BlockSpec((dst_tile, src_tile), lambda i, k: (i, k)),  # adj tile
            ],
            out_specs=pl.BlockSpec((dst_tile, HD), lambda i, k: (i, 0)),
            scratch_shapes=[pltpu.VMEM((dst_tile, HD + H), jnp.float32)],
        ),
        compiler_params=pltpu.CompilerParams(
            # dst tiles are independent (megacore-sharded); src axis is a reduction.
            dimension_semantics=("parallel", "arbitrary"),
            # Footprint at default tiles (bf16): ~2 MiB << 32 MiB scoped / 64 MiB v7x.
            vmem_limit_bytes=48 * 1024 * 1024,
        ),
    )(src_rhs_p, expand, adj_p)
    return out[:n_dst]


def ref_forward(feat_src, adj, attn_l, num_heads, in_size):
    """Pure-JAX reference mirroring the DGL/torch forward (exact masked softmax)."""
    H, D = num_heads, in_size
    h_src = feat_src.reshape(-1, H, D)
    el = jnp.sum(h_src * attn_l[None, :, :], axis=-1)                    # (N_src, H)
    e = jnp.where(el >= 0, el, NEG_SLOPE * el)
    n_dst = adj.shape[0]
    logits = jnp.broadcast_to(e[None, :, :], (n_dst, e.shape[0], H))
    mask = (adj[:, :, None] > 0)
    masked = jnp.where(mask, logits, -jnp.inf)
    m = jnp.max(masked, axis=1, keepdims=True)
    m = jnp.where(jnp.isfinite(m), m, 0.0)
    p = jnp.where(mask, jnp.exp(logits - m), 0.0)
    denom = jnp.sum(p, axis=1, keepdims=True)
    a = jnp.where(denom > 0, p / denom, 0.0)
    out = jnp.einsum('ijh,jhd->ihd', a, h_src)
    return out.reshape(n_dst, H * D)


if __name__ == "__main__":
    # Small, module-consistent shapes (non-multiples exercise the padding path).
    num_heads = 8
    in_size = 16
    n_src = 120     # padded to 128 inside the wrapper
    n_dst = 60      # padded to 64 (single parallel dst tile at this toy size)

    key = jax.random.PRNGKey(0)
    k_feat, k_attn, k_adj = jax.random.split(key, 3)

    # Source node features; torch passes feat[0] and views it as (-1, H, in_size).
    feat_src = jax.random.normal(k_feat, (n_src, num_heads * in_size), dtype=jnp.float32)

    # attn_l: nn.Parameter of shape (1, H, in_size), xavier_normal_(gain=1.414).
    fan_in, fan_out = num_heads * in_size, 1 * in_size
    std = 1.414 * (2.0 / (fan_in + fan_out)) ** 0.5
    attn_l = std * jax.random.normal(k_attn, (num_heads, in_size), dtype=jnp.float32)

    # Deterministic bipartite graph as a dense 0/1 adjacency (dst x src);
    # ensure every dst node has at least one in-edge.
    adj = (jax.random.uniform(k_adj, (n_dst, n_src)) < 0.12).astype(jnp.float32)
    adj = adj.at[jnp.arange(n_dst), jnp.arange(n_dst) % n_src].set(1.0)

    ref = ref_forward(feat_src, adj, attn_l, num_heads, in_size)

    # f32 matmul path (accuracy check; exact division is used in the kernel epilogue).
    out_f32 = hetgcn_attention(feat_src, adj, attn_l, num_heads=num_heads,
                               in_size=in_size, matmul_dtype=jnp.float32)
    out_f32 = jax.block_until_ready(out_f32)
    assert out_f32.shape == (n_dst, num_heads * in_size)
    assert jnp.allclose(out_f32, ref, atol=1e-3, rtol=1e-3), "f32 kernel mismatch vs reference"

    # bf16 matmul path (production path; adj is exact in bf16, features lose ~3 digits).
    out_bf16 = hetgcn_attention(feat_src, adj, attn_l, num_heads=num_heads,
                                in_size=in_size, matmul_dtype=jnp.bfloat16)
    out_bf16 = jax.block_until_ready(out_bf16)
    assert jnp.allclose(out_bf16, ref, atol=5e-2, rtol=5e-2), "bf16 kernel mismatch vs reference"

    # TODO(synk): feat_drop / attn_drop are identity (rate 0.0) and residual/activation are
    # disabled by default, so they are not materialized in the kernel.
    # TODO(synk): 'mean' and 'pool' aggregator branches of the module are not implemented.
    print("KERNEL_OK")
</pallas_src>

<mosaic_0001>
module attributes {stable_mosaic.version = 11 : i64} {
  func.func @hetgcn_aggregate_kernel(%arg0: i32, %arg1: i32, %arg2: memref<128x136xf32, #tpu.memory_space<vmem>>, %arg3: memref<8x128xf32, #tpu.memory_space<vmem>>, %arg4: memref<64x128xf32, #tpu.memory_space<vmem>>, %arg5: memref<64x128xf32, #tpu.memory_space<vmem>>, %arg6: memref<64x136xf32, #tpu.memory_space<vmem>>) attributes {dimension_semantics = [#tpu.dimension_semantics<parallel>, #tpu.dimension_semantics<arbitrary>], iteration_bounds = array<i64: 1, 1>, scalar_prefetch = 0 : i64, scratch_operands = 1 : i64, tpu.core_type = #tpu.core_type<tc>, window_params = [{transform_indices = @transform_0, window_bounds = array<i64: 128, 136>}, {pipeline_mode = #tpu.pipeline_mode<synchronous>, transform_indices = @transform_1, window_bounds = array<i64: 8, 128>}, {transform_indices = @transform_2, window_bounds = array<i64: 64, 128>}, {transform_indices = @transform_3, window_bounds = array<i64: 64, 128>}]} {
    %c0_i32 = arith.constant 0 : i32
    %0 = arith.cmpi eq, %arg1, %c0_i32 : i32
    %1 = arith.extui %0 : i1 to i32
    %c0_i32_0 = arith.constant 0 : i32
    %2 = arith.cmpi ne, %1, %c0_i32_0 : i32
    scf.if %2 {
      %cst_10 = arith.constant 0.000000e+00 : f32
      %12 = vector.broadcast %cst_10 : f32 to vector<64x136xf32>
      %c0_11 = arith.constant 0 : index
      %c0_12 = arith.constant 0 : index
      %13 = vector.load %arg6[%c0_11, %c0_12] : memref<64x136xf32, #tpu.memory_space<vmem>>, vector<64x136xf32>
      tpu.vector_store %arg6[%c0_11, %c0_12], %12 {strides = array<i32>} : memref<64x136xf32, #tpu.memory_space<vmem>>, vector<64x136xf32>,
    } else {
    }
    %c0 = arith.constant 0 : index
    %c0_1 = arith.constant 0 : index
    %3 = vector.load %arg6[%c0, %c0_1] : memref<64x136xf32, #tpu.memory_space<vmem>>, vector<64x136xf32>
    %c0_2 = arith.constant 0 : index
    %c0_3 = arith.constant 0 : index
    %4 = vector.load %arg4[%c0_2, %c0_3] : memref<64x128xf32, #tpu.memory_space<vmem>>, vector<64x128xf32>
    %c0_4 = arith.constant 0 : index
    %c0_5 = arith.constant 0 : index
    %5 = vector.load %arg2[%c0_4, %c0_5] : memref<128x136xf32, #tpu.memory_space<vmem>>, vector<128x136xf32>
    %cst = arith.constant dense<0.000000e+00> : vector<64x136xf32>
    %6 = tpu.matmul %4, %5, %cst {dimension_numbers = #tpu.dot_dimension_numbers<[1], [0], [0], [1], [0, 0, 1, 1], [], []>} : vector<64x128xf32>, vector<128x136xf32>, vector<64x136xf32> -> vector<64x136xf32>
    %7 = arith.addf %3, %6 : vector<64x136xf32>
    %c0_6 = arith.constant 0 : index
    %c0_7 = arith.constant 0 : index
    %8 = vector.load %arg6[%c0_6, %c0_7] : memref<64x136xf32, #tpu.memory_space<vmem>>, vector<64x136xf32>
    tpu.vector_store %arg6[%c0_6, %c0_7], %7 {strides = array<i32>} : memref<64x136xf32, #tpu.memory_space<vmem>>, vector<64x136xf32>,
    %c0_i32_8 = arith.constant 0 : i32
    %9 = arith.cmpi eq, %arg1, %c0_i32_8 : i32
    %10 = arith.extui %9 : i1 to i32
    %c0_i32_9 = arith.constant 0 : i32
    %11 = arith.cmpi ne, %10, %c0_i32_9 : i32
    scf.if %11 {
      %c0_10 = arith.constant 0 : index
      %c0_11 = arith.constant 0 : index
      %12 = vector.load %arg6[%c0_10, %c0_11] : memref<64x136xf32, #tpu.memory_space<vmem>>, vector<64x136xf32>
      %13 = vector.extract_strided_slice %12 {offsets = [0, 0], sizes = [64, 128], strides = [1, 1]} : vector<64x136xf32> to vector<64x128xf32>
      %14 = vector.extract_strided_slice %12 {offsets = [0, 128], sizes = [64, 8], strides = [1, 1]} : vector<64x136xf32> to vector<64x8xf32>
      %cst_12 = arith.constant 0.000000e+00 : f32
      %15 = vector.broadcast %cst_12 : f32 to vector<64x8xf32>
      %16 = arith.cmpf ogt, %14, %15 : vector<64x8xf32>
      %cst_13 = arith.constant 1.000000e+00 : f32
      %17 = vector.broadcast %cst_13 : f32 to vector<64x8xf32>
      %18 = arith.divf %17, %14 : vector<64x8xf32>
      %cst_14 = arith.constant 0.000000e+00 : f32
      %19 = vector.broadcast %cst_14 : f32 to vector<64x8xf32>
      %20 = arith.select %16, %18, %19 : vector<64x8xi1>, vector<64x8xf32>
      %c0_15 = arith.constant 0 : index
      %c0_16 = arith.constant 0 : index
      %21 = vector.load %arg3[%c0_15, %c0_16] : memref<8x128xf32, #tpu.memory_space<vmem>>, vector<8x128xf32>
      %cst_17 = arith.constant dense<0.000000e+00> : vector<64x128xf32>
      %22 = tpu.matmul %20, %21, %cst_17 {dimension_numbers = #tpu.dot_dimension_numbers<[1], [0], [0], [1], [0, 0, 1, 1], [], []>} : vector<64x8xf32>, vector<8x128xf32>, vector<64x128xf32> -> vector<64x128xf32>
      %23 = arith.mulf %13, %22 : vector<64x128xf32>
      %c0_18 = arith.constant 0 : index
      %c0_19 = arith.constant 0 : index
      %24 = vector.load %arg5[%c0_18, %c0_19] : memref<64x128xf32, #tpu.memory_space<vmem>>, vector<64x128xf32>
      tpu.vector_store %arg5[%c0_18, %c0_19], %23 {strides = array<i32>} : memref<64x128xf32, #tpu.memory_space<vmem>>, vector<64x128xf32>,
    } else {
    }
    return
  }
  func.func @transform_0(%arg0: i32, %arg1: i32) -> (i32, i32) {
    %c0_i32 = arith.constant 0 : i32
    %c0_i32_0 = arith.constant 0 : i32
    return %arg1, %c0_i32 : i32, i32
  }
  func.func @transform_1(%arg0: i32, %arg1: i32) -> (i32, i32) {
    %c0_i32 = arith.constant 0 : i32
    %c0_i32_0 = arith.constant 0 : i32
    %c0_i32_1 = arith.constant 0 : i32
    return %c0_i32, %c0_i32_0 : i32, i32
  }
  func.func @transform_2(%arg0: i32, %arg1: i32) -> (i32, i32) {
    %c0_i32 = arith.constant 0 : i32
    return %arg0, %arg1 : i32, i32
  }
  func.func @transform_3(%arg0: i32, %arg1: i32) -> (i32, i32) {
    %c0_i32 = arith.constant 0 : i32
    %c0_i32_0 = arith.constant 0 : i32
    return %arg0, %c0_i32 : i32, i32
  }
}

</mosaic_0001>

<bundles_post_ra>
// kernel: tpu_custom_call.1
= control target key start
LH: loop header
LB: loop body
LE: loop exit
PB: predicated region body
PF: predicated region fallthrough
CT: control target
= control target key end

     0   :  { %s754_s0 = inlined_call_operand.vmem [shape: f32[128,136], index: 0, kind: input, shape index: {}]   ;;  %s755_s1 = inlined_call_operand.vmem [shape: f32[8,128], index: 1, kind: input, shape index: {}]   ;;  %s756_s2 = inlined_call_operand.vmem [shape: f32[64,128], index: 2, kind: input, shape index: {}]   ;;  %s757_s3 = inlined_call_operand.hbm [shape: f32[64,128], index: 3, kind: output, shape index: {}]  }
   0x1   :  { %v91_v0 = vld [vmem:[%s754_s0 + $0xf8] sm:$0xff]  ;;  %v90_v1 = vld [vmem:[%s754_s0 + $0xf0] sm:$0xff]  ;;  %v89_v2 = vld [vmem:[%s754_s0 + $0xe8] sm:$0xff] }
   0x2   :  { %92 = vmatprep.subr.mxu0 %v91_v0  ;;  %v88_v3 = vld [vmem:[%s754_s0 + $0xe0] sm:$0xff]  ;;  %482 = vmatprep.subr.mxu1 %v91_v0  ;;  %v87_v4 = vld [vmem:[%s754_s0 + $0xd8] sm:$0xff]  ;;  %v86_v5 = vld [vmem:[%s754_s0 + $0xd0] sm:$0xff] }
   0x3   :  { %93 = vmatpush1.msra.mxu0 %v90_v1  ;;  %498 = vmatpush1.msra.mxu1 %v90_v1  ;;  %v85_v6 = vld [vmem:[%s754_s0 + $0xc8] sm:$0xff]  ;;  %v84_v7 = vld [vmem:[%s754_s0 + $0xc0] sm:$0xff]  ;;  %v83_v8 = vld [vmem:[%s754_s0 + $0xb8] sm:$0xff] }
   0x4   :  { %94 = vmatprep.subr.mxu0 %v89_v2  ;;  %483 = vmatprep.subr.mxu1 %v89_v2  ;;  %v82_v9 = vld [vmem:[%s754_s0 + $0xb0] sm:$0xff]  ;;  %v81_v10 = vld [vmem:[%s754_s0 + $0xa8] sm:$0xff]  ;;  %v80_v11 = vld [vmem:[%s754_s0 + $0xa0] sm:$0xff] }
   0x5   :  { %95 = vmatpush1.msra.mxu0 %v88_v3  ;;  %499 = vmatpush1.msra.mxu1 %v88_v3  ;;  %v79_v12 = vld [vmem:[%s754_s0 + $0x98] sm:$0xff]  ;;  %v78_v13 = vld [vmem:[%s754_s0 + $0x90] sm:$0xff]  ;;  %v77_v14 = vld [vmem:[%s754_s0 + $0x88] sm:$0xff] }
   0x6   :  { %96 = vmatprep.subr.mxu0 %v87_v4  ;;  %484 = vmatprep.subr.mxu1 %v87_v4  ;;  %v76_v15 = vld [vmem:[%s754_s0 + $0x80] sm:$0xff] }
   0x7   :  { %97 = vmatpush1.msra.mxu0 %v86_v5  ;;  %500 = vmatpush1.msra.mxu1 %v86_v5 }
   0x8   :  { %98 = vmatprep.subr.mxu0 %v85_v6  ;;  %485 = vmatprep.subr.mxu1 %v85_v6 }
   0x9   :  { %99 = vmatpush1.msra.mxu0 %v84_v7  ;;  %501 = vmatpush1.msra.mxu1 %v84_v7 }
   0xa   :  { %100 = vmatprep.subr.mxu0 %v83_v8  ;;  %486 = vmatprep.subr.mxu1 %v83_v8 }
   0xb   :  { %101 = vmatpush1.msra.mxu0 %v82_v9  ;;  %502 = vmatpush1.msra.mxu1 %v82_v9 }
   0xc   :  { %102 = vmatprep.subr.mxu0 %v81_v10  ;;  %487 = vmatprep.subr.mxu1 %v81_v10 }
   0xd   :  { %103 = vmatpush1.msra.mxu0 %v80_v11  ;;  %503 = vmatpush1.msra.mxu1 %v80_v11 }
   0xe   :  { %104 = vmatprep.subr.mxu0 %v79_v12  ;;  %488 = vmatprep.subr.mxu1 %v79_v12 }
   0xf   :  { %8 = vsyncpa [#allocation4], 0  ;;  %105 = vmatpush1.msra.mxu0 %v78_v13  ;;  %v75_v16 = vld [vmem:[%s754_s0 + $0x78] sm:$0xff]  ;;  %504 = vmatpush1.msra.mxu1 %v78_v13  ;;  %v74_v17 = vld [vmem:[%s754_s0 + $0x70] sm:$0xff]  ;;  %v556_v31 = vmov 0.0   ;;  %vm20_vm0 = vcmask 64512  }
  0x10   :  { %106 = vmatprep.subr.mxu0 %v77_v14  ;;  %489 = vmatprep.subr.mxu1 %v77_v14  ;;  %v73_v18 = vld [vmem:[%s754_s0 + $0x68] sm:$0xff]  ;;  %v72_v19 = vld [vmem:[%s754_s0 + $0x60] sm:$0xff]  ;;  %v71_v20 = vld [vmem:[%s754_s0 + $0x58] sm:$0xff]  ;;  %21 = vst.msk [vmem:[#allocation2 + $0x8] sm:$0xff] %vm20_vm0, %v556_v31 }
  0x11   :  { %107 = vmatpush1.msra.mxu0 %v76_v15  ;;  %505 = vmatpush1.msra.mxu1 %v76_v15  ;;  %v70_v21 = vld [vmem:[%s754_s0 + $0x50] sm:$0xff]  ;;  %v69_v22 = vld [vmem:[%s754_s0 + $0x48] sm:$0xff]  ;;  %v68_v23 = vld [vmem:[%s754_s0 + $0x40] sm:$0xff]  ;;  %23 = vst.msk [vmem:[#allocation2 + $0x18] sm:$0xff] %vm20_vm0, %v556_v31 }
  0x12   :  { %108 = vmatprep.subr.mxu0 %v75_v16  ;;  %490 = vmatprep.subr.mxu1 %v75_v16  ;;  %v67_v24 = vld [vmem:[%s754_s0 + $0x38] sm:$0xff]  ;;  %v66_v25 = vld [vmem:[%s754_s0 + $0x30] sm:$0xff]  ;;  %v65_v26 = vld [vmem:[%s754_s0 + $0x28] sm:$0xff]  ;;  %25 = vst.msk [vmem:[#allocation2 + $0x28] sm:$0xff] %vm20_vm0, %v556_v31 }
  0x13   :  { %109 = vmatpush1.msra.mxu0 %v74_v17  ;;  %506 = vmatpush1.msra.mxu1 %v74_v17  ;;  %v64_v27 = vld [vmem:[%s754_s0 + $0x20] sm:$0xff]  ;;  %v63_v28 = vld [vmem:[%s754_s0 + $0x18] sm:$0xff]  ;;  %v62_v29 = vld [vmem:[%s754_s0 + $0x10] sm:$0xff]  ;;  %27 = vst.msk [vmem:[#allocation2 + $0x38] sm:$0xff] %vm20_vm0, %v556_v31 }
  0x14   :  { %110 = vmatprep.subr.mxu0 %v73_v18  ;;  %491 = vmatprep.subr.mxu1 %v73_v18  ;;  %v61_v30 = vld [vmem:[%s754_s0 + $0x8] sm:$0xff]  ;;  %v60_v32 = vld [vmem:[%s754_s0] sm:$0xff]  ;;  %v58_v34 = vld [vmem:[%s756_s2 + $0x30] sm:$0xff]  ;;  %29 = vst.msk [vmem:[#allocation2 + $0x48] sm:$0xff] %vm20_vm0, %v556_v31 }
  0x15   :  { %111 = vmatpush1.msra.mxu0 %v72_v19  ;;  %507 = vmatpush1.msra.mxu1 %v72_v19  ;;  %v52_v33 = vld [vmem:[%s756_s2] sm:$0xff]  ;;  %v53_v35 = vld [vmem:[%s756_s2 + $0x8] sm:$0xff]  ;;  %v59_v36 = vld [vmem:[%s756_s2 + $0x38] sm:$0xff]  ;;  %31 = vst.msk [vmem:[#allocation2 + $0x58] sm:$0xff] %vm20_vm0, %v556_v31 }
  0x16   :  { %112 = vmatprep.subr.mxu0 %v71_v20  ;;  %492 = vmatprep.subr.mxu1 %v71_v20  ;;  %v54_v37 = vld [vmem:[%s756_s2 + $0x10] sm:$0xff]  ;;  %v55_v38 = vld [vmem:[%s756_s2 + $0x18] sm:$0xff]  ;;  %v56_v39 = vld [vmem:[%s756_s2 + $0x20] sm:$0xff]  ;;  %33 = vst.msk [vmem:[#allocation2 + $0x68] sm:$0xff] %vm20_vm0, %v556_v31 }
  0x17   :  { %113 = vmatpush1.msra.mxu0 %v70_v21  ;;  %508 = vmatpush1.msra.mxu1 %v70_v21  ;;  %v57_v40 = vld [vmem:[%s756_s2 + $0x28] sm:$0xff]  ;;  %35 = vst.msk [vmem:[#allocation2 + $0x78] sm:$0xff] %vm20_vm0, %v556_v31  ;;  %v289_v41 = vld [vmem:[%s755_s1] sm:$0xff]  ;;  %s557_s1 = smov [#allocation3]  }
  0x18   :  { %114 = vmatprep.subr.mxu0 %v69_v22  ;;  %493 = vmatprep.subr.mxu1 %v69_v22  ;;  %v37_v43 = vld [vmem:[#allocation2 + $0x8] sm:$0xff]  ;;  %v39_v49 = vld [vmem:[#allocation2 + $0x18] sm:$0xff]  ;;  %s440_s11 = sshll.u32 %s557_s1, 4  ;;  %s441_s11 = int_to_ptr.vmem [resolvable:$true] %s440_s11 }
  0x19   :  { %115 = vmatpush1.msra.mxu0 %v68_v23  ;;  %509 = vmatpush1.msra.mxu1 %v68_v23  ;;  %v41_v57 = vld [vmem:[#allocation2 + $0x28] sm:$0xff]  ;;  %s534_s12 = scalar_lea.vmem %s441_s11, 1024  ;;  %p539_p1 = scmp.lt.s32.totalorder %s441_s11, %s441_s11 }
  0x1a   :  { %116 = vmatprep.subr.mxu0 %v67_v24  ;;  %494 = vmatprep.subr.mxu1 %v67_v24  ;;  %v43_v63 = vld [vmem:[#allocation2 + $0x38] sm:$0xff]  ;;  %p535_p0 = scmp.ne.s32.totalorder %s441_s11, %s534_s12  ;;  %p540_p2 = scmp.lt.s32.totalorder %s534_s12, %s534_s12 }
  0x1b   :  { %117 = vmatpush1.msra.mxu0 %v66_v25  ;;  %510 = vmatpush1.msra.mxu1 %v66_v25  ;;  %v45_v4 = vld [vmem:[#allocation2 + $0x48] sm:$0xff] }
  0x1c   :  { %118 = vmatprep.subr.mxu0 %v65_v26  ;;  %495 = vmatprep.subr.mxu1 %v65_v26  ;;  %v47_v9 = vld [vmem:[#allocation2 + $0x58] sm:$0xff]  ;;  %p541_p3 = por %p540_p2, %p539_p1 }
  0x1d   :  { %119 = vmatpush1.msra.mxu0 %v64_v27  ;;  %156 = vmatprep.mubr.f32.mxu0 %v556_v31  ;;  %v49_v46 = vld [vmem:[#allocation2 + $0x68] sm:$0xff] }
  0x1e   :  { %120 = vmatprep.subr.mxu0 %v63_v28  ;;  %511 = vmatpush1.msra.mxu1 %v64_v27  ;;  %v51_v54 = vld [vmem:[#allocation2 + $0x78] sm:$0xff]  ;;  %p542_p4 = pnand %p541_p3, %p535_p0 }
  0x1f   :  { %121 = vmatpush1.msra.mxu0 %v62_v29  ;;  %496 = vmatprep.subr.mxu1 %v63_v28 }
  0x20   :  { %122 = vmatprep.subr.mxu0 %v61_v30  ;;  %512 = vmatpush1.msra.mxu1 %v62_v29 }
  0x21   :  { %123 = vmatpush1.msra.mxu0 %v60_v32  ;;  %497 = vmatprep.subr.mxu1 %v61_v30 }
  0x22   :  { %157 = vmatmul.mubr.f32.vlgmr.msra.gmra.mxu0 %v52_v33  ;;  %513 = vmatpush1.msra.mxu1 %v60_v32 }
  0x23   :  { %162 = vmatprep.mubr.f32.mxu0 %v556_v31  ;;  %192 = vmatprep.mubr.f32.mxu1 %v556_v31 }
  0x24   :  { %193 = vmatmul.mubr.f32.vlgmr.msra.gmra.mxu1 %v58_v34  ;;  %468 = vmatprep.subr.mxu1 %v289_v41 }
  0x25   :  { %198 = vmatprep.mubr.f32.mxu1 %v556_v31  ;;  %469 = vmatpush3.msra.mxu1 %v289_v41 }
  0x26   :  { %163 = vmatmul.mubr.f32.gmra.mxu0 %v53_v35 }
  0x27   :  { %168 = vmatprep.mubr.f32.mxu0 %v556_v31 }
  0x28   :  { %199 = vmatmul.mubr.f32.gmra.mxu1 %v59_v36 }
  0x2a   :  { %169 = vmatmul.mubr.f32.gmra.mxu0 %v54_v37 }
  0x2b   :  { %174 = vmatprep.mubr.f32.mxu0 %v556_v31 }
  0x2e   :  { %175 = vmatmul.mubr.f32.gmra.mxu0 %v55_v38 }
  0x2f   :  { %180 = vmatprep.mubr.f32.mxu0 %v556_v31 }
  0x32   :  { %181 = vmatmul.mubr.f32.gmra.mxu0 %v56_v39 }
  0x33   :  { %186 = vmatprep.mubr.f32.mxu0 %v556_v31 }
  0x36   :  { %187 = vmatmul.mubr.f32.gmra.mxu0 %v57_v40 }
  0xe2   :  { %v711_v42 = vpop.f32.mrf.mxu0 }
  0xe4   :  { %v160_v44 = vpop.f32.mrf.mxu0  ;;  %v713_v45 = vpop.f32.mrf.mxu1 }
  0xe5   :  { %v206_v47 = vadd.f32 %v160_v44, %v37_v43 }
  0xe6   :  { %v715_v48 = vpop.f32.mrf.mxu0  ;;  %v196_v50 = vpop.f32.mrf.mxu1 }
  0xe7   :  { %223 = vst.msk [vmem:[#allocation2 + $0x8] sm:$0xff] %vm20_vm0, %v206_v47  ;;  %v218_v51 = vadd.f32 %v196_v50, %v49_v46 }
  0xe8   :  { %v166_v52 = vpop.f32.mrf.mxu0  ;;  %v718_v53 = vpop.f32.mrf.mxu1 }
  0xe9   :  { %v208_v55 = vadd.f32 %v166_v52, %v39_v49  ;;  %235 = vst.msk [vmem:[#allocation2 + $0x68] sm:$0xff] %vm20_vm0, %v218_v51 }
  0xea   :  { %v721_v56 = vpop.f32.mrf.mxu0  ;;  %v202_v58 = vpop.f32.mrf.mxu1 }
  0xeb   :  { %225 = vst.msk [vmem:[#allocation2 + $0x18] sm:$0xff] %vm20_vm0, %v208_v55  ;;  %v220_v59 = vadd.f32 %v202_v58, %v51_v54 }
  0xec   :  { %v172_v60 = vpop.f32.mrf.mxu0 }
  0xed   :  { %v210_v61 = vadd.f32 %v172_v60, %v41_v57  ;;  %237 = vst.msk [vmem:[#allocation2 + $0x78] sm:$0xff] %vm20_vm0, %v220_v59 }
  0xee   :  { %v725_v62 = vpop.f32.mrf.mxu0  ;;  %v242_v0 = vld [vmem:[#allocation2 + $0x8] sm:$0xff] }
  0xef   :  { %227 = vst.msk [vmem:[#allocation2 + $0x28] sm:$0xff] %vm20_vm0, %v210_v61  ;;  %518 = vrcp.f32 %v242_v0  ;;  %vm257_vm1 = vcmp.gt.f32.partialorder %v242_v0, 0.0 }
  0xf0   :  { %v178_v1 = vpop.f32.mrf.mxu0  ;;  %v254_v17 = vld [vmem:[#allocation2 + $0x68] sm:$0xff] }
  0xf1   :  { %v212_v2 = vadd.f32 %v178_v1, %v43_v63  ;;  %vm263_vm6 = vcmp.gt.f32.partialorder %v254_v17, 0.0 }
  0xf2   :  { %v728_v3 = vpop.f32.mrf.mxu0  ;;  %v244_v5 = vld [vmem:[#allocation2 + $0x18] sm:$0xff] }
  0xf3   :  { %229 = vst.msk [vmem:[#allocation2 + $0x38] sm:$0xff] %vm20_vm0, %v212_v2  ;;  %520 = vrcp.f32 %v244_v5  ;;  %vm258_vm2 = vcmp.gt.f32.partialorder %v244_v5, 0.0 }
  0xf4   :  { %v184_v6 = vpop.f32.mrf.mxu0  ;;  %v256_v21 = vld [vmem:[#allocation2 + $0x78] sm:$0xff] }
  0xf5   :  { %v214_v7 = vadd.f32 %v184_v6, %v45_v4  ;;  %vm264_vm8 = vcmp.gt.f32.partialorder %v256_v21, 0.0 }
  0xf6   :  { %v731_v8 = vpop.f32.mrf.mxu0  ;;  %v246_v10 = vld [vmem:[#allocation2 + $0x28] sm:$0xff] }
  0xf7   :  { %231 = vst.msk [vmem:[#allocation2 + $0x48] sm:$0xff] %vm20_vm0, %v214_v7  ;;  %522 = vrcp.f32 %v246_v10  ;;  %vm259_vm3 = vcmp.gt.f32.partialorder %v246_v10, 0.0 }
  0xf8   :  { %v190_v11 = vpop.f32.mrf.mxu0 }
  0xf9   :  { %v216_v12 = vadd.f32 %v190_v11, %v47_v9 }
  0xfa   :  { %v248_v13 = vld [vmem:[#allocation2 + $0x38] sm:$0xff] }
  0xfb   :  { %233 = vst.msk [vmem:[#allocation2 + $0x58] sm:$0xff] %vm20_vm0, %v216_v12  ;;  %524 = vrcp.f32 %v248_v13  ;;  %vm260_vm4 = vcmp.gt.f32.partialorder %v248_v13, 0.0 }
  0xfc   :  { %v519_v14 = vpop.eup %518 }
  0xfd   :  { %v281_v15 = vsel %vm257_vm1, %v519_v14, 0.0 }
  0xfe   :  { %470 = vmatprep.mubr.msk.f32.mxu1 %vm20_vm0, %v281_v15  ;;  %v250_v16 = vld [vmem:[#allocation2 + $0x48] sm:$0xff] }
  0xff   :  { %526 = vrcp.f32 %v250_v16  ;;  %vm261_vm5 = vcmp.gt.f32.partialorder %v250_v16, 0.0 }
 0x100   :  { %v521_v18 = vpop.eup %520  ;;  %528 = vrcp.f32 %v254_v17 }
 0x101   :  { %v282_v19 = vsel %vm258_vm2, %v521_v18, 0.0 }
 0x102   :  { %471 = vmatmul.mubr.msk.f32.vlgmr.msra.gmra.mxu1 %vm20_vm0, %v282_v19  ;;  %v252_v20 = vld [vmem:[#allocation2 + $0x58] sm:$0xff] }
 0x103   :  { %530 = vrcp.f32 %v252_v20  ;;  %vm262_vm7 = vcmp.gt.f32.partialorder %v252_v20, 0.0 }
 0x104   :  { %v523_v22 = vpop.eup %522  ;;  %532 = vrcp.f32 %v256_v21 }
 0x105   :  { %v283_v23 = vsel %vm259_vm3, %v523_v22, 0.0 }
 0x106   :  { %473 = vmatprep.mubr.msk.f32.mxu1 %vm20_vm0, %v283_v23 }
 0x108   :  { %v525_v24 = vpop.eup %524 }
 0x109   :  { %v284_v25 = vsel %vm260_vm4, %v525_v24, 0.0 }
 0x10a   :  { %474 = vmatmul.mubr.msk.f32.gmra.mxu1 %vm20_vm0, %v284_v25 }
 0x10c   :  { %v527_v26 = vpop.eup %526 }
 0x10d   :  { %v285_v27 = vsel %vm261_vm5, %v527_v26, 0.0  ;;  %v529_v28 = vpop.eup %528 }
 0x10e   :  { %476 = vmatprep.mubr.msk.f32.mxu1 %vm20_vm0, %v285_v27  ;;  %v287_v32 = vsel %vm263_vm6, %v529_v28, 0.0 }
 0x110   :  { %v531_v29 = vpop.eup %530 }
 0x111   :  { %v286_v30 = vsel %vm262_vm7, %v531_v29, 0.0  ;;  %v533_v31 = vpop.eup %532 }
 0x112   :  { %477 = vmatmul.mubr.msk.f32.gmra.mxu1 %vm20_vm0, %v286_v30  ;;  %v288_v33 = vsel %vm264_vm8, %v533_v31, 0.0 }
 0x113   :  { %479 = vmatprep.mubr.msk.f32.mxu1 %vm20_vm0, %v287_v32 }
 0x116   :  { %480 = vmatmul.mubr.msk.f32.gmra.mxu1 %vm20_vm0, %v288_v33 }
 0x1c2   :  { %v472_v34 = vpop.f32.mrf.mxu1 }
 0x1c3   :  { %v420_v35 = vmul.f32 %v472_v34, %v715_v48 }
 0x1c4   :  { %v380_v36 = vpop.f32.mrf.mxu1 }
 0x1c5   :  { %428 = vst [vmem:[#allocation3 + $0x8] sm:$0xff] %v420_v35  ;;  %v419_v37 = vmul.f32 %v380_v36, %v711_v42 }
 0x1c7   :  { %427 = vst [vmem:[#allocation3] sm:$0xff] %v419_v37 }
 0x1ca   :  { %v475_v38 = vpop.f32.mrf.mxu1 }
 0x1cb   :  { %v422_v39 = vmul.f32 %v475_v38, %v725_v62 }
 0x1cc   :  { %v390_v40 = vpop.f32.mrf.mxu1 }
 0x1cd   :  { %430 = vst [vmem:[#allocation3 + $0x18] sm:$0xff] %v422_v39  ;;  %v421_v41 = vmul.f32 %v390_v40, %v721_v56 }
 0x1cf   :  { %429 = vst [vmem:[#allocation3 + $0x10] sm:$0xff] %v421_v41 }
 0x1d2   :  { %v478_v43 = vpop.f32.mrf.mxu1 }
 0x1d3   :  { %v424_v44 = vmul.f32 %v478_v43, %v731_v8 }
 0x1d4   :  { %v400_v46 = vpop.f32.mrf.mxu1 }
 0x1d5   :  { %432 = vst [vmem:[#allocation3 + $0x28] sm:$0xff] %v424_v44  ;;  %v423_v47 = vmul.f32 %v400_v46, %v728_v3 }
 0x1d6   :  { %v481_v48 = vpop.f32.mrf.mxu1 }
 0x1d7   :  { %431 = vst [vmem:[#allocation3 + $0x20] sm:$0xff] %v423_v47  ;;  %v426_v42 = vmul.f32 %v481_v48, %v718_v53 }
 0x1d8   :  { %v410_v49 = vpop.f32.mrf.mxu1 }
 0x1d9   :  { %434 = vst [vmem:[#allocation3 + $0x38] sm:$0xff] %v426_v42  ;;  %v425_v50 = vmul.f32 %v410_v49, %v713_v45 }
 0x1db   :  { %433 = vst [vmem:[#allocation3 + $0x30] sm:$0xff] %v425_v50 }
 0x1dc   :  { %545 = shalt.err (!%p542_p4)
}
 0x1dd   :  { %s558_s13 = smov 128   ;;  %s559_s14 = smov 8  }
 0x1de   :  { %446 = dma.vmem_to_hbm [thread:$0]  %s441_s11, 1024, %s757_s3, [#allocation4], %s558_s13, %s558_s13, %s559_s14  }
 0x1df   :  { %554 = dma.done.wait [#allocation4], 1024  }
 0x1e0   :  { %555 = vsyncadd [#allocation4], 4294966272 }
 0x1e1   :  { %450 = vsyncpa [#allocation4], 1 }

</bundles_post_ra>
